<compile_context>
chip_gen: v7x
topology: tpu7x:2x2x1
jax: 0.10.0
libtpu: 0.0.40
codegen_flags: <defaults>
</compile_context>

<pallas_src>
import jax
import jax.numpy as jnp
from jax.experimental import pallas as pl
from jax.experimental.pallas import tpu as pltpu

NUM_ACTIONS = 4            # cfg.NUM_ACTIONS
IN_DIM, H1, H2 = 8, 128, 256

MAX_TB = 1024              # max rows per grid step (sweep-friendly constant)
ROW_ALIGN = 16             # bf16 sublane packing: 16 rows per vreg


def _round_up(n, m):
    return ((n + m - 1) // m) * m


def _choose_tiling(batch):
    """Pick (TB, B_pad): tile rows + padded batch.  TB is 16-row aligned and
    capped at MAX_TB; non-tiny batches get an even number (>=2) of grid steps
    so the 'parallel' batch axis can feed both v7x TensorCores."""
    b = _round_up(batch, ROW_ALIGN)
    if b <= 2 * ROW_ALIGN:                 # tiny batch: single tile / single step
        return b, b
    n_tiles = max(2, -(-b // MAX_TB))      # ceil div, at least 2 steps
    if n_tiles % 2:                        # prefer an even step count (2 TCs)
        n_tiles += 1
    tb = _round_up(-(-b // n_tiles), ROW_ALIGN)
    b_pad = _round_up(b, tb)
    return tb, b_pad


def dqn_mlp_kernel(x_ref, w1_ref, b1_ref, w2_ref, b2_ref, w3_ref, b3_ref, o_ref):
    cdt = w1_ref.dtype                     # MXU compute dtype (bf16 or f32)
    # Layer 1: (TB, 8) @ (8, 128) -> f32 accumulate, bias + ReLU in f32.
    x = x_ref[...].astype(cdt)
    h1 = jnp.dot(x, w1_ref[...], preferred_element_type=jnp.float32)
    h1 = jnp.maximum(h1 + b1_ref[...], 0.0)
    # Layer 2: (TB, 128) @ (128, 256)
    h2 = jnp.dot(h1.astype(cdt), w2_ref[...], preferred_element_type=jnp.float32)
    h2 = jnp.maximum(h2 + b2_ref[...], 0.0)
    # Output layer: (TB, 256) @ (256, 4); output block spans the full 4-wide
    # array, so the HBM writeback is a small contiguous stream.
    out = jnp.dot(h2.astype(cdt), w3_ref[...], preferred_element_type=jnp.float32)
    o_ref[...] = (out + b3_ref[...]).astype(o_ref.dtype)


def prepare_params(w1, b1, w2, b2, w3, b3, compute_dtype=jnp.bfloat16):
    """One-time weight cast to the MXU compute dtype (biases stay f32).
    Weights are stored as (in, out), i.e. the PyTorch (out, in) transposed.
    Call once at init so the forward pass does no per-call weight processing."""
    cast = lambda w: jnp.asarray(w, compute_dtype)
    bias = lambda b: jnp.asarray(b, jnp.float32).reshape(1, -1)
    return (cast(w1), bias(b1), cast(w2), bias(b2), cast(w3), bias(b3))


@jax.jit
def dqn_mlp_forward(x, w1, b1, w2, b2, w3, b3):
    """x: (B, 8) f32; params from prepare_params().  Returns (B, NUM_ACTIONS) f32."""
    B = x.shape[0]
    TB, B_pad = _choose_tiling(B)

    # Only a row pad (if needed); x stays f32 and is cast inside the kernel,
    # so no extra wrapper pass over the activations.
    if B_pad == B:
        x_p = x
    else:
        x_p = jnp.zeros((B_pad, IN_DIM), x.dtype).at[:B, :].set(x)

    grid = (B_pad // TB,)
    const = lambda shape: pl.BlockSpec(shape, lambda i: (0, 0))  # VMEM-resident
    # TODO(synk): pipeline_mode=pl.Buffered(1) on the constant weight specs would
    # shave a second (unused) VMEM buffer; left off to keep lowering conservative.

    out = pl.pallas_call(
        dqn_mlp_kernel,
        out_shape=jax.ShapeDtypeStruct((B_pad, NUM_ACTIONS), jnp.float32),
        grid_spec=pl.GridSpec(
            grid=grid,
            in_specs=[
                pl.BlockSpec((TB, IN_DIM), lambda i: (i, 0)),   # x tile per step
                const((IN_DIM, H1)), const((1, H1)),            # W1, b1
                const((H1, H2)),     const((1, H2)),            # W2, b2
                const((H2, NUM_ACTIONS)), const((1, NUM_ACTIONS)),  # W3, b3
            ],
            out_specs=pl.BlockSpec((TB, NUM_ACTIONS), lambda i: (i, 0)),
        ),
        compiler_params=pltpu.CompilerParams(
            dimension_semantics=("parallel",)),   # batch steps are independent
    )(x_p, w1, b1, w2, b2, w3, b3)

    return out if B_pad == B else out[:B]


def init_params(key):
    """Deterministic synthetic init (PyTorch-like uniform fan_in scaling)."""
    ks = jax.random.split(key, 6)

    def linear(kw, kb, fan_in, fan_out):
        bound = 1.0 / jnp.sqrt(fan_in)
        # stored as (in, out) == PyTorch weight (out, in) transposed
        w = jax.random.uniform(kw, (fan_in, fan_out), jnp.float32, -bound, bound)
        b = jax.random.uniform(kb, (1, fan_out), jnp.float32, -bound, bound)
        return w, b

    w1, b1 = linear(ks[0], ks[1], IN_DIM, H1)
    w2, b2 = linear(ks[2], ks[3], H1, H2)
    w3, b3 = linear(ks[4], ks[5], H2, NUM_ACTIONS)
    return w1, b1, w2, b2, w3, b3


def reference_forward(x, w1, b1, w2, b2, w3, b3):
    h1 = jnp.maximum(x @ w1 + b1, 0.0)
    h2 = jnp.maximum(h1 @ w2 + b2, 0.0)
    return h2 @ w3 + b3


if __name__ == "__main__":
    key = jax.random.PRNGKey(0)
    k_params, k_x = jax.random.split(key)
    raw_params = init_params(k_params)

    B = 8
    x = jax.random.normal(k_x, (B, IN_DIM), jnp.float32)
    ref = reference_forward(x, *raw_params)

    # f32 compute path: must match the reference tightly.
    params_f32 = prepare_params(*raw_params, compute_dtype=jnp.float32)
    out_f32 = jax.block_until_ready(dqn_mlp_forward(x, *params_f32))
    assert out_f32.shape == (B, NUM_ACTIONS)
    assert jnp.allclose(out_f32, ref, atol=1e-5, rtol=1e-5), "f32 mismatch vs reference"

    # bf16 MXU path (default deployment path): looser tolerance, same semantics.
    params_bf16 = prepare_params(*raw_params, compute_dtype=jnp.bfloat16)
    out_bf16 = jax.block_until_ready(dqn_mlp_forward(x, *params_bf16))
    assert out_bf16.shape == (B, NUM_ACTIONS)
    assert jnp.allclose(out_bf16, ref, atol=5e-2, rtol=5e-2), "bf16 mismatch vs reference"

    # Larger batch to exercise the multi-step (pipelined, 2-TC-parallel) path.
    B2 = 1000
    x2 = jax.random.normal(jax.random.PRNGKey(1), (B2, IN_DIM), jnp.float32)
    out2 = jax.block_until_ready(dqn_mlp_forward(x2, *params_bf16))
    ref2 = reference_forward(x2, *raw_params)
    assert out2.shape == (B2, NUM_ACTIONS)
    assert jnp.allclose(out2, ref2, atol=5e-2, rtol=5e-2), "batched bf16 mismatch"

    print("KERNEL_OK")
</pallas_src>

<mosaic_0001>
module attributes {stable_mosaic.version = 11 : i64} {
  func.func @dqn_mlp_kernel(%arg0: i32, %arg1: memref<16x8xf32, #tpu.memory_space<vmem>>, %arg2: memref<8x128xf32, #tpu.memory_space<vmem>>, %arg3: memref<1x128xf32, #tpu.memory_space<vmem>>, %arg4: memref<128x256xf32, #tpu.memory_space<vmem>>, %arg5: memref<1x256xf32, #tpu.memory_space<vmem>>, %arg6: memref<256x4xf32, #tpu.memory_space<vmem>>, %arg7: memref<1x4xf32, #tpu.memory_space<vmem>>, %arg8: memref<16x4xf32, #tpu.memory_space<vmem>>) attributes {dimension_semantics = [#tpu.dimension_semantics<parallel>], iteration_bounds = array<i64: 1>, scalar_prefetch = 0 : i64, scratch_operands = 0 : i64, tpu.core_type = #tpu.core_type<tc>, window_params = [{transform_indices = @transform_0, window_bounds = array<i64: 16, 8>}, {pipeline_mode = #tpu.pipeline_mode<synchronous>, transform_indices = @transform_1, window_bounds = array<i64: 8, 128>}, {pipeline_mode = #tpu.pipeline_mode<synchronous>, transform_indices = @transform_2, window_bounds = array<i64: 1, 128>}, {pipeline_mode = #tpu.pipeline_mode<synchronous>, transform_indices = @transform_3, window_bounds = array<i64: 128, 256>}, {pipeline_mode = #tpu.pipeline_mode<synchronous>, transform_indices = @transform_4, window_bounds = array<i64: 1, 256>}, {pipeline_mode = #tpu.pipeline_mode<synchronous>, transform_indices = @transform_5, window_bounds = array<i64: 256, 4>}, {pipeline_mode = #tpu.pipeline_mode<synchronous>, transform_indices = @transform_6, window_bounds = array<i64: 1, 4>}, {transform_indices = @transform_7, window_bounds = array<i64: 16, 4>}]} {
    %c0 = arith.constant 0 : index
    %c0_0 = arith.constant 0 : index
    %0 = vector.load %arg1[%c0, %c0_0] : memref<16x8xf32, #tpu.memory_space<vmem>>, vector<16x8xf32>
    %c0_1 = arith.constant 0 : index
    %c0_2 = arith.constant 0 : index
    %1 = vector.load %arg2[%c0_1, %c0_2] : memref<8x128xf32, #tpu.memory_space<vmem>>, vector<8x128xf32>
    %cst = arith.constant dense<0.000000e+00> : vector<16x128xf32>
    %2 = tpu.matmul %0, %1, %cst {dimension_numbers = #tpu.dot_dimension_numbers<[1], [0], [0], [1], [0, 0, 1, 1], [], []>} : vector<16x8xf32>, vector<8x128xf32>, vector<16x128xf32> -> vector<16x128xf32>
    %c0_3 = arith.constant 0 : index
    %c0_4 = arith.constant 0 : index
    %3 = vector.load %arg3[%c0_3, %c0_4] : memref<1x128xf32, #tpu.memory_space<vmem>>, vector<1x128xf32>
    %4 = vector.broadcast %3 : vector<1x128xf32> to vector<16x128xf32>
    %5 = arith.addf %2, %4 : vector<16x128xf32>
    %cst_5 = arith.constant 0.000000e+00 : f32
    %6 = vector.broadcast %cst_5 : f32 to vector<16x128xf32>
    %7 = arith.maximumf %5, %6 : vector<16x128xf32>
    %c0_6 = arith.constant 0 : index
    %c0_7 = arith.constant 0 : index
    %8 = vector.load %arg4[%c0_6, %c0_7] : memref<128x256xf32, #tpu.memory_space<vmem>>, vector<128x256xf32>
    %cst_8 = arith.constant dense<0.000000e+00> : vector<16x256xf32>
    %9 = tpu.matmul %7, %8, %cst_8 {dimension_numbers = #tpu.dot_dimension_numbers<[1], [0], [0], [1], [0, 0, 1, 1], [], []>} : vector<16x128xf32>, vector<128x256xf32>, vector<16x256xf32> -> vector<16x256xf32>
    %c0_9 = arith.constant 0 : index
    %c0_10 = arith.constant 0 : index
    %10 = vector.load %arg5[%c0_9, %c0_10] : memref<1x256xf32, #tpu.memory_space<vmem>>, vector<1x256xf32>
    %11 = vector.broadcast %10 : vector<1x256xf32> to vector<16x256xf32>
    %12 = arith.addf %9, %11 : vector<16x256xf32>
    %cst_11 = arith.constant 0.000000e+00 : f32
    %13 = vector.broadcast %cst_11 : f32 to vector<16x256xf32>
    %14 = arith.maximumf %12, %13 : vector<16x256xf32>
    %c0_12 = arith.constant 0 : index
    %c0_13 = arith.constant 0 : index
    %15 = vector.load %arg6[%c0_12, %c0_13] : memref<256x4xf32, #tpu.memory_space<vmem>>, vector<256x4xf32>
    %cst_14 = arith.constant dense<0.000000e+00> : vector<16x4xf32>
    %16 = tpu.matmul %14, %15, %cst_14 {dimension_numbers = #tpu.dot_dimension_numbers<[1], [0], [0], [1], [0, 0, 1, 1], [], []>} : vector<16x256xf32>, vector<256x4xf32>, vector<16x4xf32> -> vector<16x4xf32>
    %c0_15 = arith.constant 0 : index
    %c0_16 = arith.constant 0 : index
    %17 = vector.load %arg7[%c0_15, %c0_16] : memref<1x4xf32, #tpu.memory_space<vmem>>, vector<1x4xf32>
    %18 = vector.broadcast %17 : vector<1x4xf32> to vector<16x4xf32>
    %19 = arith.addf %16, %18 : vector<16x4xf32>
    %c0_17 = arith.constant 0 : index
    %c0_18 = arith.constant 0 : index
    %20 = vector.load %arg8[%c0_17, %c0_18] : memref<16x4xf32, #tpu.memory_space<vmem>>, vector<16x4xf32>
    tpu.vector_store %arg8[%c0_17, %c0_18], %19 {strides = array<i32>} : memref<16x4xf32, #tpu.memory_space<vmem>>, vector<16x4xf32>,
    return
  }
  func.func @transform_0(%arg0: i32) -> (i32, i32) {
    %c0_i32 = arith.constant 0 : i32
    %c0_i32_0 = arith.constant 0 : i32
    return %arg0, %c0_i32 : i32, i32
  }
  func.func @transform_1(%arg0: i32) -> (i32, i32) {
    %c0_i32 = arith.constant 0 : i32
    %c0_i32_0 = arith.constant 0 : i32
    %c0_i32_1 = arith.constant 0 : i32
    return %c0_i32, %c0_i32_0 : i32, i32
  }
  func.func @transform_2(%arg0: i32) -> (i32, i32) {
    %c0_i32 = arith.constant 0 : i32
    %c0_i32_0 = arith.constant 0 : i32
    %c0_i32_1 = arith.constant 0 : i32
    return %c0_i32, %c0_i32_0 : i32, i32
  }
  func.func @transform_3(%arg0: i32) -> (i32, i32) {
    %c0_i32 = arith.constant 0 : i32
    %c0_i32_0 = arith.constant 0 : i32
    %c0_i32_1 = arith.constant 0 : i32
    return %c0_i32, %c0_i32_0 : i32, i32
  }
  func.func @transform_4(%arg0: i32) -> (i32, i32) {
    %c0_i32 = arith.constant 0 : i32
    %c0_i32_0 = arith.constant 0 : i32
    %c0_i32_1 = arith.constant 0 : i32
    return %c0_i32, %c0_i32_0 : i32, i32
  }
  func.func @transform_5(%arg0: i32) -> (i32, i32) {
    %c0_i32 = arith.constant 0 : i32
    %c0_i32_0 = arith.constant 0 : i32
    %c0_i32_1 = arith.constant 0 : i32
    return %c0_i32, %c0_i32_0 : i32, i32
  }
  func.func @transform_6(%arg0: i32) -> (i32, i32) {
    %c0_i32 = arith.constant 0 : i32
    %c0_i32_0 = arith.constant 0 : i32
    %c0_i32_1 = arith.constant 0 : i32
    return %c0_i32, %c0_i32_0 : i32, i32
  }
  func.func @transform_7(%arg0: i32) -> (i32, i32) {
    %c0_i32 = arith.constant 0 : i32
    %c0_i32_0 = arith.constant 0 : i32
    return %arg0, %c0_i32 : i32, i32
  }
}

</mosaic_0001>

<bundles_post_ra>
// kernel: dqn_mlp_forward.1
= control target key start
LH: loop header
LB: loop body
LE: loop exit
PB: predicated region body
PF: predicated region fallthrough
CT: control target
= control target key end

     0   :  { %vm36_vm0 = vcmask 64512   ;;  %v481_v51 = vmov 0.0   ;;  %vm359_vm1 = vcmask 31744   ;;  %s738_s1 = inlined_call_operand.vmem [shape: f32[8,128], index: 1, kind: input, shape index: {}]   ;;  %s739_s0 = inlined_call_operand.vmem [shape: f32[16,8], index: 0, kind: input, shape index: {}]   ;;  %s740_s3 = inlined_call_operand.vmem [shape: f32[128,256], index: 3, kind: input, shape index: {}]   ;;  %s741_s5 = inlined_call_operand.vmem [shape: f32[256,4], index: 5, kind: input, shape index: {}]   ;;  %s742_s2 = inlined_call_operand.vmem [shape: f32[1,128], index: 2, kind: input, shape index: {}]   ;;  %s743_s4 = inlined_call_operand.vmem [shape: f32[1,256], index: 4, kind: input, shape index: {}]   ;;  %s744_s6 = inlined_call_operand.vmem [shape: f32[1,4], index: 6, kind: input, shape index: {}]   ;;  %s745_s7 = inlined_call_operand.vmem [shape: f32[16,4], index: 7, kind: output, shape index: {}]  }
   0x1   :  { %v28_v0 = vld [vmem:[%s738_s1] sm:$0xff]  ;;  %v27_v2 = vld [vmem:[%s739_s0 + $0x8] sm:$0xff]  ;;  %v123_v4 = vld [vmem:[%s740_s3 + $0x18] sm:$0xff]  ;;  %228 = vmatprep.mubr.f32.mxu1 %v481_v51 }
   0x2   :  { %v26_v1 = vld [vmem:[%s739_s0] sm:$0xff]  ;;  %411 = vmatprep.subr.mxu0 %v28_v0  ;;  %v121_v3 = vld [vmem:[%s740_s3 + $0x8] sm:$0xff]  ;;  %v122_v7 = vld [vmem:[%s740_s3 + $0x10] sm:$0xff] }
   0x3   :  { %413 = vmatprep.mubr.msk.f32.mxu0 %vm36_vm0, %v26_v1  ;;  %v120_v5 = vld [vmem:[%s740_s3] sm:$0xff]  ;;  %412 = vmatpush3.msra.mxu0 %v28_v0  ;;  %v416_v6 = vpack.c.bf16 %v123_v4, %v121_v3  ;;  %v125_v8 = vld [vmem:[%s740_s3 + $0x28] sm:$0xff]  ;;  %v127_v9 = vld [vmem:[%s740_s3 + $0x38] sm:$0xff] }
   0x4   :  { %414 = vmatmul.mubr.msk.f32.vlgmr.msra.gmra.mrb[0].mxu0 %vm36_vm0, %v27_v2  ;;  %v418_v10 = vpack.c.bf16 %v122_v7, %v120_v5  ;;  %v420_v11 = vpack.c.bf16 %v127_v9, %v125_v8  ;;  %v124_v12 = vld [vmem:[%s740_s3 + $0x20] sm:$0xff]  ;;  %v126_v13 = vld [vmem:[%s740_s3 + $0x30] sm:$0xff]  ;;  %v129_v14 = vld [vmem:[%s740_s3 + $0x48] sm:$0xff] }
   0x5   :  { %417 = vmatprep.subr.bf16.mxu1 %v416_v6  ;;  %v131_v15 = vld [vmem:[%s740_s3 + $0x58] sm:$0xff]  ;;  %v422_v16 = vpack.c.bf16 %v126_v13, %v124_v12  ;;  %v128_v18 = vld [vmem:[%s740_s3 + $0x40] sm:$0xff]  ;;  %v130_v19 = vld [vmem:[%s740_s3 + $0x50] sm:$0xff] }
   0x6   :  { %419 = vmatpush1.bf16.msra.mxu1 %v418_v10  ;;  %v424_v17 = vpack.c.bf16 %v131_v15, %v129_v14  ;;  %v133_v20 = vld [vmem:[%s740_s3 + $0x68] sm:$0xff]  ;;  %v135_v21 = vld [vmem:[%s740_s3 + $0x78] sm:$0xff]  ;;  %v426_v22 = vpack.c.bf16 %v130_v19, %v128_v18  ;;  %v132_v24 = vld [vmem:[%s740_s3 + $0x60] sm:$0xff] }
   0x7   :  { %421 = vmatprep.subr.bf16.mxu1 %v420_v11  ;;  %v428_v23 = vpack.c.bf16 %v135_v21, %v133_v20  ;;  %v134_v25 = vld [vmem:[%s740_s3 + $0x70] sm:$0xff]  ;;  %v137_v26 = vld [vmem:[%s740_s3 + $0x88] sm:$0xff]  ;;  %v139_v27 = vld [vmem:[%s740_s3 + $0x98] sm:$0xff] }
   0x8   :  { %v430_v28 = vpack.c.bf16 %v134_v25, %v132_v24  ;;  %v432_v29 = vpack.c.bf16 %v139_v27, %v137_v26  ;;  %v136_v30 = vld [vmem:[%s740_s3 + $0x80] sm:$0xff]  ;;  %v138_v31 = vld [vmem:[%s740_s3 + $0x90] sm:$0xff]  ;;  %v141_v32 = vld [vmem:[%s740_s3 + $0xa8] sm:$0xff] }
   0x9   :  { %v143_v33 = vld [vmem:[%s740_s3 + $0xb8] sm:$0xff]  ;;  %v434_v34 = vpack.c.bf16 %v138_v31, %v136_v30  ;;  %v140_v36 = vld [vmem:[%s740_s3 + $0xa0] sm:$0xff]  ;;  %v142_v37 = vld [vmem:[%s740_s3 + $0xb0] sm:$0xff] }
   0xa   :  { %423 = vmatpush1.bf16.msra.mxu1 %v422_v16  ;;  %v436_v35 = vpack.c.bf16 %v143_v33, %v141_v32  ;;  %v145_v38 = vld [vmem:[%s740_s3 + $0xc8] sm:$0xff]  ;;  %v147_v39 = vld [vmem:[%s740_s3 + $0xd8] sm:$0xff]  ;;  %v438_v40 = vpack.c.bf16 %v142_v37, %v140_v36  ;;  %v144_v42 = vld [vmem:[%s740_s3 + $0xc0] sm:$0xff] }
   0xb   :  { %425 = vmatprep.subr.bf16.mxu1 %v424_v17  ;;  %v440_v41 = vpack.c.bf16 %v147_v39, %v145_v38  ;;  %v146_v43 = vld [vmem:[%s740_s3 + $0xd0] sm:$0xff]  ;;  %v149_v45 = vld [vmem:[%s740_s3 + $0xe8] sm:$0xff]  ;;  %v151_v46 = vld [vmem:[%s740_s3 + $0xf8] sm:$0xff] }
   0xc   :  { %v442_v44 = vpack.c.bf16 %v146_v43, %v144_v42  ;;  %v444_v47 = vpack.c.bf16 %v151_v46, %v149_v45  ;;  %v148_v48 = vld [vmem:[%s740_s3 + $0xe0] sm:$0xff]  ;;  %v150_v49 = vld [vmem:[%s740_s3 + $0xf0] sm:$0xff]  ;;  %v262_v53 = vld [vmem:[%s741_s5 + $0x88] sm:$0xff]  ;;  %v154_v43 = vlaneseq }
   0xd   :  { %v446_v50 = vpack.c.bf16 %v150_v49, %v148_v48  ;;  %v261_v52 = vld [vmem:[%s741_s5 + $0x80] sm:$0xff]  ;;  %v246_v56 = vld [vmem:[%s741_s5 + $0x8] sm:$0xff]  ;;  %v263_v57 = vld [vmem:[%s741_s5 + $0x90] sm:$0xff] }
   0xe   :  { %427 = vmatpush1.bf16.msra.mxu1 %v426_v22  ;;  %v245_v54 = vld [vmem:[%s741_s5] sm:$0xff]  ;;  %v448_v55 = vpack.c.bf16 %v262_v53, %v261_v52  ;;  %v264_v58 = vld [vmem:[%s741_s5 + $0x98] sm:$0xff]  ;;  %v247_v61 = vld [vmem:[%s741_s5 + $0x10] sm:$0xff] }
   0xf   :  { %429 = vmatprep.subr.bf16.mxu1 %v428_v23  ;;  %v450_v59 = vpack.c.bf16 %v246_v56, %v245_v54  ;;  %v452_v60 = vpack.c.bf16 %v264_v58, %v263_v57  ;;  %v248_v62 = vld [vmem:[%s741_s5 + $0x18] sm:$0xff]  ;;  %v265_v63 = vld [vmem:[%s741_s5 + $0xa0] sm:$0xff]  ;;  %v266_v0 = vld [vmem:[%s741_s5 + $0xa8] sm:$0xff] }
  0x10   :  { %449 = vmatprep.subr.bf16.mxu0 %v448_v55  ;;  %v454_v1 = vpack.c.bf16 %v248_v62, %v247_v61  ;;  %v456_v2 = vpack.c.bf16 %v266_v0, %v265_v63  ;;  %v249_v3 = vld [vmem:[%s741_s5 + $0x20] sm:$0xff]  ;;  %v250_v4 = vld [vmem:[%s741_s5 + $0x28] sm:$0xff]  ;;  %v267_v5 = vld [vmem:[%s741_s5 + $0xb0] sm:$0xff] }
  0x11   :  { %451 = vmatpush3.bf16.msra.mxu0 %v450_v59  ;;  %v268_v6 = vld [vmem:[%s741_s5 + $0xb8] sm:$0xff]  ;;  %v458_v7 = vpack.c.bf16 %v250_v4, %v249_v3  ;;  %v251_v9 = vld [vmem:[%s741_s5 + $0x30] sm:$0xff]  ;;  %v269_v11 = vld [vmem:[%s741_s5 + $0xc0] sm:$0xff] }
  0x12   :  { %431 = vmatpush1.bf16.msra.mxu1 %v430_v28  ;;  %453 = vmatprep.subr.bf16.mxu0 %v452_v60  ;;  %v460_v8 = vpack.c.bf16 %v268_v6, %v267_v5  ;;  %v252_v10 = vld [vmem:[%s741_s5 + $0x38] sm:$0xff]  ;;  %v270_v12 = vld [vmem:[%s741_s5 + $0xc8] sm:$0xff]  ;;  %v253_v15 = vld [vmem:[%s741_s5 + $0x40] sm:$0xff] }
  0x13   :  { %433 = vmatprep.subr.bf16.mxu1 %v432_v29  ;;  %v462_v13 = vpack.c.bf16 %v252_v10, %v251_v9  ;;  %v464_v14 = vpack.c.bf16 %v270_v12, %v269_v11  ;;  %v254_v16 = vld [vmem:[%s741_s5 + $0x48] sm:$0xff]  ;;  %v271_v17 = vld [vmem:[%s741_s5 + $0xd0] sm:$0xff]  ;;  %v272_v18 = vld [vmem:[%s741_s5 + $0xd8] sm:$0xff] }
  0x14   :  { %v466_v19 = vpack.c.bf16 %v254_v16, %v253_v15  ;;  %v468_v20 = vpack.c.bf16 %v272_v18, %v271_v17  ;;  %v255_v21 = vld [vmem:[%s741_s5 + $0x50] sm:$0xff]  ;;  %v256_v22 = vld [vmem:[%s741_s5 + $0x58] sm:$0xff]  ;;  %v273_v23 = vld [vmem:[%s741_s5 + $0xe0] sm:$0xff] }
  0x15   :  { %455 = vmatpush3.bf16.msra.mxu0 %v454_v1  ;;  %v274_v24 = vld [vmem:[%s741_s5 + $0xe8] sm:$0xff]  ;;  %v470_v25 = vpack.c.bf16 %v256_v22, %v255_v21  ;;  %v366_v27 = vld [vmem:[%s742_s2] ss:$0 sm:$0xff]  ;;  %v275_v37 = vld [vmem:[%s741_s5 + $0xf0] sm:$0xff] }
  0x16   :  { %435 = vmatpush1.bf16.msra.mxu1 %v434_v34  ;;  %457 = vmatprep.subr.bf16.mxu0 %v456_v2  ;;  %v472_v26 = vpack.c.bf16 %v274_v24, %v273_v23  ;;  %v257_v34 = vld [vmem:[%s741_s5 + $0x60] sm:$0xff]  ;;  %v276_v38 = vld [vmem:[%s741_s5 + $0xf8] sm:$0xff] }
  0x17   :  { %437 = vmatprep.subr.bf16.mxu1 %v436_v35  ;;  %v258_v35 = vld [vmem:[%s741_s5 + $0x68] sm:$0xff]  ;;  %v476_v39 = vpack.c.bf16 %v276_v38, %v275_v37  ;;  %v152_v46 = vld [vmem:[%s743_s4] sm:$0x3] }
  0x18   :  { %v474_v36 = vpack.c.bf16 %v258_v35, %v257_v34  ;;  %v369_v63 = vld [vmem:[%s744_s6] ss:$0 sm:$0xff] }
  0x19   :  { %459 = vmatpush3.bf16.msra.mxu0 %v458_v7 }
  0x1a   :  { %439 = vmatpush1.bf16.msra.mxu1 %v438_v40  ;;  %461 = vmatprep.subr.bf16.mxu0 %v460_v8  ;;  %v259_v40 = vld [vmem:[%s741_s5 + $0x70] sm:$0xff] }
  0x1b   :  { %441 = vmatprep.subr.bf16.mxu1 %v440_v41  ;;  %v260_v41 = vld [vmem:[%s741_s5 + $0x78] sm:$0xff] }
  0x1c   :  { %v478_v42 = vpack.c.bf16 %v260_v41, %v259_v40 }
  0x1d   :  { %463 = vmatpush3.bf16.msra.mxu0 %v462_v13 }
  0x1e   :  { %443 = vmatpush1.bf16.msra.mxu1 %v442_v44  ;;  %465 = vmatprep.subr.bf16.mxu0 %v464_v14  ;;  %v155_v44 = vshrl.u32 %v154_v43, 7 }
  0x1f   :  { %445 = vmatprep.subr.bf16.mxu1 %v444_v47 }
  0x20   :  { %v156_v45 = vsub.s32 0, %v155_v44  ;;  %v160_v47 = vsub.s32 1, %v155_v44 }
  0x21   :  { %467 = vmatpush3.bf16.msra.mxu0 %v466_v19 }
  0x22   :  { %447 = vmatpush1.bf16.msra.mxu1 %v446_v50  ;;  %469 = vmatprep.subr.bf16.mxu0 %v468_v20  ;;  %v157_v48 = vrot.slane %v152_v46, %v156_v45  ;;  %v161_v49 = vrot.slane %v152_v46, %v160_v47 }
  0x25   :  { %471 = vmatpush3.bf16.msra.mxu0 %v470_v25 }
  0x26   :  { %473 = vmatprep.subr.bf16.mxu0 %v472_v26 }
  0x29   :  { %475 = vmatpush3.bf16.msra.mxu0 %v474_v36 }
  0x2a   :  { %477 = vmatprep.subr.bf16.mxu0 %v476_v39 }
  0x2d   :  { %479 = vmatpush3.bf16.msra.mxu0 %v478_v42 }
  0xd7   :  { %v415_v28 = vpop.f32.mrb[0].mxu0 }
  0xd8   :  { %v109_v29 = vpop.f32.mrb[1].mxu0  ;;  %v115_v31 = vadd.f32 %v415_v28, %v366_v27 }
  0xd9   :  { %v110_v30 = vadd.f32 %v366_v27, %v109_v29 }
  0xda   :  { %v119_v33 = vmax.f32 %v115_v31, 0.0 }
  0xdb   :  { %v118_v32 = vmax.f32 %v110_v30, 0.0 }
  0xdd   :  { %229 = vmatmul.mubr.f32.vlgmr.msra.gmra.mrb[0].mxu1 %v118_v32 }
  0xde   :  { %234 = vmatprep.mubr.f32.mxu1 %v481_v51 }
  0xe1   :  { %235 = vmatmul.mubr.f32.gmra.mrb[2].mxu1 %v119_v33 }
 0x1b0   :  { %v230_v50 = vpop.f32.mrb[0].mxu1 }
 0x1b1   :  { %v231_v51 = vadd.f32 %v230_v50, %v157_v48  ;;  %v232_v52 = vpop.f32.mrb[1].mxu1 }
 0x1b2   :  { %v233_v53 = vadd.f32 %v232_v52, %v161_v49 }
 0x1b3   :  { %v241_v56 = vmax.f32 %v231_v51, 0.0 }
 0x1b4   :  { %v242_v54 = vmax.f32 %v233_v53, 0.0  ;;  %v236_v55 = vpop.f32.mrb[2].mxu1 }
 0x1b5   :  { %v237_v57 = vadd.f32 %v236_v55, %v157_v48  ;;  %v238_v58 = vpop.f32.mrb[3].mxu1 }
 0x1b6   :  { %v239_v59 = vadd.f32 %v238_v58, %v161_v49  ;;  %348 = vmatprep.mubr.f32.mxu0 %v242_v54 }
 0x1b7   :  { %349 = vmatmul.mubr.f32.vlgmr.msra.gmra.mrb[2].mxu0 %v241_v56  ;;  %v243_v61 = vmax.f32 %v237_v57, 0.0 }
 0x1b8   :  { %v244_v60 = vmax.f32 %v239_v59, 0.0 }
 0x1ba   :  { %353 = vmatprep.mubr.f32.mxu0 %v244_v60 }
 0x1bb   :  { %354 = vmatmul.mubr.f32.gmra.mrb[4].mxu0 %v243_v61 }
 0x28a   :  { %v405_v62 = vpop.f32.mrb[2].mxu0 }
 0x28b   :  { %v406_v0 = vpop.f32.mrb[3].mxu0 }
 0x28c   :  { %v407_v1 = vadd.f32 %v406_v0, %v405_v62 }
 0x28e   :  { %v351_v2 = vadd.f32 %v407_v1, %v369_v63  ;;  %v408_v3 = vpop.f32.mrb[4].mxu0 }
 0x28f   :  { %v409_v4 = vpop.f32.mrb[5].mxu0 }
 0x290   :  { %360 = vst.msk [vmem:[%s745_s7] sm:$0xff] %vm359_vm1, %v351_v2  ;;  %v410_v5 = vadd.f32 %v409_v4, %v408_v3 }
 0x292   :  { %v356_v6 = vadd.f32 %v410_v5, %v369_v63 }
 0x294   :  { %361 = vst.msk [vmem:[%s745_s7 + $0x8] sm:$0xff] %vm359_vm1, %v356_v6 }

</bundles_post_ra>
